<compile_context>
chip_gen: v7x
topology: tpu7x:2x2x1
jax: 0.10.0
libtpu: 0.0.40
codegen_flags: <defaults>
</compile_context>

<pallas_src>
import functools

import jax
import jax.numpy as jnp
from jax.experimental import pallas as pl
from jax.experimental.pallas import tpu as pltpu


def _round_up(a, b):
    return (a + b - 1) // b * b


def _prenorm_drop_kernel(x_ref, gamma_ref, beta_ref, w_ref, b_ref, bits_ref,
                         o_ref, *, p, eps):
    # ---- LayerNorm over last dim (f32 math) --------------------------------
    x = x_ref[...].astype(jnp.float32)                        # (tm, D)
    mean = jnp.mean(x, axis=-1, keepdims=True)
    xc = x - mean
    var = jnp.mean(xc * xc, axis=-1, keepdims=True)           # biased, as nn.LayerNorm
    xn = xc * jax.lax.rsqrt(var + eps)
    xn = xn * gamma_ref[...] + beta_ref[...]

    # ---- fn: Linear(dim, dim) on the MXU (bf16 inputs, f32 accumulate) -----
    y = jnp.dot(xn.astype(jnp.bfloat16), w_ref[...],
                preferred_element_type=jnp.float32)
    y = y + b_ref[...]

    # ---- Dropout (inverted dropout, integer-threshold keep mask) -----------
    if p > 0.0:
        thresh = jnp.uint32(int(p * (2.0 ** 32)))              # P(keep) = 1 - p
        keep = bits_ref[...] >= thresh
        y = jnp.where(keep, y * (1.0 / (1.0 - p)), 0.0)

    o_ref[...] = y.astype(o_ref.dtype)


def prenorm_drop(x, gamma, beta, w, b, key, *, dropout_rate, eps=1e-5,
                 block_m=512, training=True):
    """dropout(Linear(LayerNorm(x))) fused in one Pallas call.

    x: (B, N, D) float32; gamma/beta/b: (D,); w: (D, D); key: jax PRNG key.
    """
    B, N, D = x.shape
    M = B * N
    p = float(dropout_rate) if training else 0.0

    # Row tiling: roofline/MXU-friendly default, clamped to the problem size,
    # kept a multiple of 8 sublanes; rows padded to a tile multiple.
    tm = _round_up(min(block_m, _round_up(M, 8)), 8)
    Mp = _round_up(M, tm)
    n_tiles = Mp // tm

    x2 = x.reshape(M, D).astype(jnp.float32)
    if Mp != M:
        x2 = jnp.pad(x2, ((0, Mp - M), (0, 0)))

    gamma2 = gamma.reshape(1, D).astype(jnp.float32)
    beta2 = beta.reshape(1, D).astype(jnp.float32)
    b2 = b.reshape(1, D).astype(jnp.float32)
    w_bf16 = w.astype(jnp.bfloat16)

    if p > 0.0:
        bits = jax.random.bits(key, (Mp, D), dtype=jnp.uint32)
    else:
        bits = jnp.zeros((Mp, D), dtype=jnp.uint32)

    # Explicit VMEM budget: double-buffered x/bits/out tiles + resident params,
    # clamped to v7x's 64 MiB physical VMEM (also covers v5e's 16 MiB scoped
    # default being too small for large tiles).
    tile_bytes = tm * D * (4 + 4 + 4)          # x f32 + bits u32 + out f32
    param_bytes = D * D * 2 + 3 * D * 4        # bf16 w + gamma/beta/b
    vmem_limit = int(min(max(2 * (tile_bytes + param_bytes) + (2 << 20),
                             4 << 20), 64 << 20))

    kernel = functools.partial(_prenorm_drop_kernel, p=p, eps=float(eps))

    out = pl.pallas_call(
        kernel,
        out_shape=jax.ShapeDtypeStruct((Mp, D), jnp.float32),
        grid_spec=pltpu.PrefetchScalarGridSpec(
            num_scalar_prefetch=0,
            grid=(n_tiles,),
            in_specs=[
                pl.BlockSpec((tm, D), lambda i: (i, 0)),   # x rows
                pl.BlockSpec((1, D), lambda i: (0, 0)),    # gamma
                pl.BlockSpec((1, D), lambda i: (0, 0)),    # beta
                pl.BlockSpec((D, D), lambda i: (0, 0)),    # w (bf16)
                pl.BlockSpec((1, D), lambda i: (0, 0)),    # b
                pl.BlockSpec((tm, D), lambda i: (i, 0)),   # dropout bits
            ],
            out_specs=pl.BlockSpec((tm, D), lambda i: (i, 0)),
        ),
        compiler_params=pltpu.CompilerParams(
            dimension_semantics=("parallel",),
            vmem_limit_bytes=vmem_limit),
    )(x2, gamma2, beta2, w_bf16, b2, bits)

    return out[:M].reshape(B, N, D)


if __name__ == "__main__":
    # Small shapes consistent with a transformer block: batch=2, seq=8, dim=32.
    B, N, D = 2, 8, 32
    dropout_rate = 0.1

    key = jax.random.PRNGKey(0)
    kx, kw, kdrop = jax.random.split(key, 3)

    x = jax.random.normal(kx, (B, N, D), dtype=jnp.float32)

    # Deterministic parameter init (synthetic, not a checkpoint):
    # LayerNorm: gamma=1, beta=0 (PyTorch default init).
    gamma = jnp.ones((D,), dtype=jnp.float32)
    beta = jnp.zeros((D,), dtype=jnp.float32)
    # fn = Linear(D, D): small random weight, zero bias.
    w = jax.random.normal(kw, (D, D), dtype=jnp.float32) / jnp.sqrt(D)
    b = jnp.zeros((D,), dtype=jnp.float32)

    # Training path with dropout on.
    out = prenorm_drop(x, gamma, beta, w, b, kdrop, dropout_rate=dropout_rate)
    out = jax.block_until_ready(out)
    assert out.shape == (B, N, D)
    assert out.dtype == jnp.float32
    assert bool(jnp.all(jnp.isfinite(out)))
    zero_frac = float(jnp.mean((out == 0.0).astype(jnp.float32)))
    assert 0.01 < zero_frac < 0.3, f"unexpected dropout zero fraction {zero_frac}"

    # Deterministic part (dropout off) checked against a pure-JAX reference.
    ref = jnp.einsum(
        "bnd,de->bne",
        (x - x.mean(-1, keepdims=True))
        / jnp.sqrt(x.var(-1, keepdims=True) + 1e-5) * gamma + beta,
        w) + b
    got = prenorm_drop(x, gamma, beta, w, b, kdrop, dropout_rate=0.0)
    got = jax.block_until_ready(got)
    assert jnp.allclose(got, ref, atol=5e-2, rtol=5e-2), float(
        jnp.max(jnp.abs(got - ref)))

    print("KERNEL_OK")
</pallas_src>

<mosaic_0001>
module attributes {stable_mosaic.version = 11 : i64} {
  func.func @_prenorm_drop_kernel(%arg0: i32, %arg1: memref<16x32xf32, #tpu.memory_space<vmem>>, %arg2: memref<1x32xf32, #tpu.memory_space<vmem>>, %arg3: memref<1x32xf32, #tpu.memory_space<vmem>>, %arg4: memref<32x32xbf16, #tpu.memory_space<vmem>>, %arg5: memref<1x32xf32, #tpu.memory_space<vmem>>, %arg6: memref<16x32xi32, #tpu.memory_space<vmem>>, %arg7: memref<16x32xf32, #tpu.memory_space<vmem>>) attributes {dimension_semantics = [#tpu.dimension_semantics<parallel>], iteration_bounds = array<i64: 1>, scalar_prefetch = 0 : i64, scratch_operands = 0 : i64, tpu.core_type = #tpu.core_type<tc>, window_params = [{transform_indices = @transform_0, window_bounds = array<i64: 16, 32>}, {pipeline_mode = #tpu.pipeline_mode<synchronous>, transform_indices = @transform_1, window_bounds = array<i64: 1, 32>}, {pipeline_mode = #tpu.pipeline_mode<synchronous>, transform_indices = @transform_2, window_bounds = array<i64: 1, 32>}, {pipeline_mode = #tpu.pipeline_mode<synchronous>, transform_indices = @transform_3, window_bounds = array<i64: 32, 32>}, {pipeline_mode = #tpu.pipeline_mode<synchronous>, transform_indices = @transform_4, window_bounds = array<i64: 1, 32>}, {transform_indices = @transform_5, window_bounds = array<i64: 16, 32>}, {transform_indices = @transform_6, window_bounds = array<i64: 16, 32>}]} {
    %c0 = arith.constant 0 : index
    %c0_0 = arith.constant 0 : index
    %0 = vector.load %arg1[%c0, %c0_0] : memref<16x32xf32, #tpu.memory_space<vmem>>, vector<16x32xf32>
    %cst = arith.constant dense<0.000000e+00> : vector<16xf32>
    %1 = vector.multi_reduction <add>, %0, %cst [1] : vector<16x32xf32> to vector<16xf32>
    %2 = vector.shape_cast %1 : vector<16xf32> to vector<16x1xf32>
    %cst_1 = arith.constant 3.200000e+01 : f32
    %3 = vector.broadcast %cst_1 : f32 to vector<16x1xf32>
    %4 = arith.divf %2, %3 : vector<16x1xf32>
    %5 = vector.broadcast %4 : vector<16x1xf32> to vector<16x32xf32>
    %6 = arith.subf %0, %5 : vector<16x32xf32>
    %7 = arith.mulf %6, %6 : vector<16x32xf32>
    %cst_2 = arith.constant dense<0.000000e+00> : vector<16xf32>
    %8 = vector.multi_reduction <add>, %7, %cst_2 [1] : vector<16x32xf32> to vector<16xf32>
    %9 = vector.shape_cast %8 : vector<16xf32> to vector<16x1xf32>
    %cst_3 = arith.constant 3.200000e+01 : f32
    %10 = vector.broadcast %cst_3 : f32 to vector<16x1xf32>
    %11 = arith.divf %9, %10 : vector<16x1xf32>
    %cst_4 = arith.constant 9.99999974E-6 : f32
    %12 = vector.broadcast %cst_4 : f32 to vector<16x1xf32>
    %13 = arith.addf %11, %12 : vector<16x1xf32>
    %14 = math.rsqrt %13 : vector<16x1xf32>
    %15 = vector.broadcast %14 : vector<16x1xf32> to vector<16x32xf32>
    %16 = arith.mulf %6, %15 : vector<16x32xf32>
    %c0_5 = arith.constant 0 : index
    %c0_6 = arith.constant 0 : index
    %17 = vector.load %arg2[%c0_5, %c0_6] : memref<1x32xf32, #tpu.memory_space<vmem>>, vector<1x32xf32>
    %18 = vector.broadcast %17 : vector<1x32xf32> to vector<16x32xf32>
    %19 = arith.mulf %16, %18 : vector<16x32xf32>
    %c0_7 = arith.constant 0 : index
    %c0_8 = arith.constant 0 : index
    %20 = vector.load %arg3[%c0_7, %c0_8] : memref<1x32xf32, #tpu.memory_space<vmem>>, vector<1x32xf32>
    %21 = vector.broadcast %20 : vector<1x32xf32> to vector<16x32xf32>
    %22 = arith.addf %19, %21 : vector<16x32xf32>
    %23 = arith.truncf %22 : vector<16x32xf32> to vector<16x32xbf16>
    %c0_9 = arith.constant 0 : index
    %c0_10 = arith.constant 0 : index
    %24 = vector.load %arg4[%c0_9, %c0_10] : memref<32x32xbf16, #tpu.memory_space<vmem>>, vector<32x32xbf16>
    %cst_11 = arith.constant dense<0.000000e+00> : vector<16x32xf32>
    %25 = tpu.matmul %23, %24, %cst_11 {dimension_numbers = #tpu.dot_dimension_numbers<[1], [0], [0], [1], [0, 0, 1, 1], [], []>} : vector<16x32xbf16>, vector<32x32xbf16>, vector<16x32xf32> -> vector<16x32xf32>
    %c0_12 = arith.constant 0 : index
    %c0_13 = arith.constant 0 : index
    %26 = vector.load %arg5[%c0_12, %c0_13] : memref<1x32xf32, #tpu.memory_space<vmem>>, vector<1x32xf32>
    %27 = vector.broadcast %26 : vector<1x32xf32> to vector<16x32xf32>
    %28 = arith.addf %25, %27 : vector<16x32xf32>
    %c0_14 = arith.constant 0 : index
    %c0_15 = arith.constant 0 : index
    %29 = vector.load %arg6[%c0_14, %c0_15] : memref<16x32xi32, #tpu.memory_space<vmem>>, vector<16x32xi32>
    %c429496729_i32 = arith.constant 429496729 : i32
    %30 = vector.broadcast %c429496729_i32 : i32 to vector<16x32xi32>
    %31 = arith.cmpi uge, %29, %30 : vector<16x32xi32>
    %cst_16 = arith.constant 1.11111116 : f32
    %32 = vector.broadcast %cst_16 : f32 to vector<16x32xf32>
    %33 = arith.mulf %28, %32 : vector<16x32xf32>
    %cst_17 = arith.constant 0.000000e+00 : f32
    %34 = vector.broadcast %cst_17 : f32 to vector<16x32xf32>
    %35 = arith.select %31, %33, %34 : vector<16x32xi1>, vector<16x32xf32>
    %c0_18 = arith.constant 0 : index
    %c0_19 = arith.constant 0 : index
    %36 = vector.load %arg7[%c0_18, %c0_19] : memref<16x32xf32, #tpu.memory_space<vmem>>, vector<16x32xf32>
    tpu.vector_store %arg7[%c0_18, %c0_19], %35 {strides = array<i32>} : memref<16x32xf32, #tpu.memory_space<vmem>>, vector<16x32xf32>,
    return
  }
  func.func @transform_0(%arg0: i32) -> (i32, i32) {
    %c0_i32 = arith.constant 0 : i32
    %c0_i32_0 = arith.constant 0 : i32
    return %arg0, %c0_i32 : i32, i32
  }
  func.func @transform_1(%arg0: i32) -> (i32, i32) {
    %c0_i32 = arith.constant 0 : i32
    %c0_i32_0 = arith.constant 0 : i32
    %c0_i32_1 = arith.constant 0 : i32
    return %c0_i32, %c0_i32_0 : i32, i32
  }
  func.func @transform_2(%arg0: i32) -> (i32, i32) {
    %c0_i32 = arith.constant 0 : i32
    %c0_i32_0 = arith.constant 0 : i32
    %c0_i32_1 = arith.constant 0 : i32
    return %c0_i32, %c0_i32_0 : i32, i32
  }
  func.func @transform_3(%arg0: i32) -> (i32, i32) {
    %c0_i32 = arith.constant 0 : i32
    %c0_i32_0 = arith.constant 0 : i32
    %c0_i32_1 = arith.constant 0 : i32
    return %c0_i32, %c0_i32_0 : i32, i32
  }
  func.func @transform_4(%arg0: i32) -> (i32, i32) {
    %c0_i32 = arith.constant 0 : i32
    %c0_i32_0 = arith.constant 0 : i32
    %c0_i32_1 = arith.constant 0 : i32
    return %c0_i32, %c0_i32_0 : i32, i32
  }
  func.func @transform_5(%arg0: i32) -> (i32, i32) {
    %c0_i32 = arith.constant 0 : i32
    %c0_i32_0 = arith.constant 0 : i32
    return %arg0, %c0_i32 : i32, i32
  }
  func.func @transform_6(%arg0: i32) -> (i32, i32) {
    %c0_i32 = arith.constant 0 : i32
    %c0_i32_0 = arith.constant 0 : i32
    return %arg0, %c0_i32 : i32, i32
  }
}

</mosaic_0001>

<bundles_post_ra>
// kernel: tpu_custom_call.1
= control target key start
LH: loop header
LB: loop body
LE: loop exit
PB: predicated region body
PF: predicated region fallthrough
CT: control target
= control target key end

     0   :  { %11 = vsyncpa [#allocation3], 0  ;;  %s453_s0 = inlined_call_operand.hbm [shape: f32[16,32], index: 0, kind: input, shape index: {}]   ;;  %s454_s1 = inlined_call_operand.vmem [shape: f32[1,32], index: 1, kind: input, shape index: {}]   ;;  %s455_s2 = inlined_call_operand.vmem [shape: f32[1,32], index: 2, kind: input, shape index: {}]   ;;  %s456_s3 = inlined_call_operand.hbm [shape: bf16[32,32], index: 3, kind: input, shape index: {}]   ;;  %s457_s4 = inlined_call_operand.hbm [shape: f32[1,32], index: 4, kind: input, shape index: {}]   ;;  %s458_s5 = inlined_call_operand.vmem [shape: u32[16,32], index: 5, kind: input, shape index: {}]   ;;  %s459_s6 = inlined_call_operand.hbm [shape: f32[16,32], index: 6, kind: output, shape index: {}]  }
   0x1   :  { %12 = vsyncpa [#allocation6], 0 }
   0x2   :  { %13 = vsyncpa [#allocation4], 0  ;;  %s335_s21 = smov [#allocation5]   ;;  %s241_s25 = scalar_lea.hbm %s456_s3, 256 }
   0x3   :  { %s35_s22 = sshll.u32 %s335_s21, 4  ;;  %p242_p0 = scmp.ne.s32.totalorder %s456_s3, %s241_s25  ;;  %s36_s22 = int_to_ptr.vmem [resolvable:$true] %s35_s22 }
   0x4   :  { %p245_p1 = scmp.lt.u32.totalorder %s241_s25, %s456_s3 }
   0x6   :  { %p247_p2 = pnand %p245_p1, %p242_p0 }
   0x8   :  { %250 = shalt.err (!%p247_p2)
}
   0x9   :  { %s251_s30 = scalar_lea.vmem %s36_s22, 256  ;;  %p256_p4 = scmp.lt.s32.totalorder %s36_s22, %s36_s22 }
   0xa   :  { %p252_p3 = scmp.ne.s32.totalorder %s36_s22, %s251_s30  ;;  %p257_p5 = scmp.lt.s32.totalorder %s251_s30, %s251_s30 }
   0xc   :  { %p258_p6 = por %p257_p5, %p256_p4 }
   0xe   :  { %p259_p7 = pnand %p258_p6, %p252_p3 }
  0x10   :  { %262 = shalt.err (!%p259_p7)
}
  0x11   :  { %s336_s7 = smov 64   ;;  %s337_s8 = smov 4  }
  0x12   :  { %41 = dma.hbm_to_vmem [thread:$0]  %s456_s3, 256, %s36_s22, [#allocation6], %s336_s7, %s336_s7, %s337_s8  }
  0x13   :  { %s338_s11 = smov [#allocation2]   ;;  %s263_s15 = scalar_lea.hbm %s453_s0, 256 }
  0x14   :  { %s19_s12 = sshll.u32 %s338_s11, 4  ;;  %p264_p8 = scmp.ne.s32.totalorder %s453_s0, %s263_s15  ;;  %s20_s12 = int_to_ptr.vmem [resolvable:$true] %s19_s12 }
  0x15   :  { %p267_p9 = scmp.lt.u32.totalorder %s263_s15, %s453_s0 }
  0x17   :  { %p269_p10 = pnand %p267_p9, %p264_p8 }
  0x19   :  { %272 = shalt.err (!%p269_p10)
}
  0x1a   :  { %s273_s20 = scalar_lea.vmem %s20_s12, 256  ;;  %p278_p12 = scmp.lt.s32.totalorder %s20_s12, %s20_s12 }
  0x1b   :  { %p274_p11 = scmp.ne.s32.totalorder %s20_s12, %s273_s20  ;;  %p279_p13 = scmp.lt.s32.totalorder %s273_s20, %s273_s20 }
  0x1d   :  { %p280_p0 = por %p279_p13, %p278_p12 }
  0x1f   :  { %p281_p1 = pnand %p280_p0, %p274_p11 }
  0x21   :  { %284 = shalt.err (!%p281_p1)
}
  0x22   :  { %s339_s3 = smov 128   ;;  %s340_s21 = smov 8  }
  0x23   :  { %25 = dma.hbm_to_vmem [thread:$0]  %s453_s0, 256, %s20_s12, [#allocation3], %s339_s3, %s339_s3, %s340_s21  }
  0x24   :  { %s341_s24 = smov [#allocation7]   ;;  %s285_s28 = scalar_lea.hbm %s457_s4, 16 }
  0x25   :  { %s48_s25 = sshll.u32 %s341_s24, 4  ;;  %p286_p2 = scmp.ne.s32.totalorder %s457_s4, %s285_s28  ;;  %s49_s25 = int_to_ptr.vmem [resolvable:$true] %s48_s25 }
  0x26   :  { %p289_p3 = scmp.lt.u32.totalorder %s285_s28, %s457_s4 }
  0x28   :  { %p291_p4 = pnand %p289_p3, %p286_p2 }
  0x2a   :  { %294 = shalt.err (!%p291_p4)
}
  0x2b   :  { %s295_s9 = scalar_lea.vmem %s49_s25, 16  ;;  %s299_s0 = scalar_lea.vmem %s49_s25, 32 }
  0x2c   :  { %p296_p5 = scmp.ne.s32.totalorder %s49_s25, %s295_s9  ;;  %p300_p6 = scmp.lt.s32.totalorder %s49_s25, %s49_s25 }
  0x2d   :  { %p301_p7 = scmp.lt.s32.totalorder %s299_s0, %s295_s9 }
  0x2f   :  { %p302_p8 = por %p301_p7, %p300_p6 }
  0x31   :  { %p303_p9 = pnand %p302_p8, %p296_p5 }
  0x33   :  { %306 = shalt.err (!%p303_p9)
}
  0x34   :  { %51 = dma.hbm_to_vmem [thread:$0]  %s457_s4, 16, %s49_s25, [#allocation6]  }
  0x35   :  { %329 = dma.done.wait [#allocation3], 256  }
  0x36   :  { %330 = vsyncadd [#allocation3], 4294967040 }
  0x37   :  { %331 = dma.done.wait [#allocation6], 272  }
  0x38   :  { %332 = vsyncadd [#allocation6], 4294967024  ;;  %vm66_vm0 = vcmask 261120   ;;  %v64_v0 = vld [vmem:[#allocation2] sm:$0xff]  ;;  %v65_v1 = vld [vmem:[#allocation2 + $0x8] sm:$0xff]  ;;  %v342_v15 = vmov 0.0  }
  0x39   :  { %v67_v2 = vsel %vm66_vm0, %v64_v0, 0.0  ;;  %v70_v3 = vsel %vm66_vm0, %v65_v1, 0.0  ;;  %v235_v14 = vld [vmem:[#allocation5] sm:$0xff]   ;;  %217 = vmatprep.subr.bf16.mxu0 %v342_v15  ;;  %v236_v16 = vld [vmem:[#allocation5 + $0x8] sm:$0xff]   ;;  %vm343_vm1 = vmmov 0   ;;  %v180_v35 = vld [vmem:[%s458_s5] sm:$0xff] }
  0x3a   :  { %68 = vadd.xlane.f32.xlu0 %v67_v2  ;;  %218 = vmatpush3.bf16.msra.mxu0 %v235_v14  ;;  %v208_v25 = vld [vmem:[%s454_s1] ss:$0 sm:$0xff]  ;;  %v181_v39 = vld [vmem:[%s458_s5 + $0x8] sm:$0xff]  ;;  %vm182_vm2 = vcmp.ge.u32.totalorder %v180_v35, 429496729 }
  0x3b   :  { %221 = vmatprep.mubr.msk.bf16.mxu0 %vm343_vm1, %v342_v15  ;;  %219 = vmatprep.subr.bf16.mxu0 %v342_v15  ;;  %v209_v29 = vld [vmem:[%s455_s2] ss:$0 sm:$0xff]  ;;  %s344_s2 = smov [#allocation8]   ;;  %vm183_vm3 = vcmp.ge.u32.totalorder %v181_v39, 429496729 }
  0x3c   :  { %v210_v34 = vld [vmem:[#allocation7] ss:$0 sm:$0xff]  ;;  %s195_s18 = sshll.u32 %s344_s2, 4  ;;  %s196_s18 = int_to_ptr.vmem [resolvable:$true] %s195_s18 }
  0x3d   :  { %s307_s19 = scalar_lea.vmem %s196_s18, 256  ;;  %p312_p11 = scmp.lt.s32.totalorder %s196_s18, %s196_s18 }
  0x3e   :  { %71 = vadd.xlane.f32.xlu0 %v70_v3  ;;  %220 = vmatpush3.bf16.msra.mxu0 %v236_v16  ;;  %p308_p10 = scmp.ne.s32.totalorder %s196_s18, %s307_s19  ;;  %p313_p12 = scmp.lt.s32.totalorder %s307_s19, %s307_s19 }
  0x40   :  { %p314_p13 = por %p313_p12, %p312_p11 }
  0x42   :  { %p315_p0 = pnand %p314_p13, %p308_p10 }
  0xc7   :  { %v69_v4 = vpop.xlane.xlu0 %68 }
  0xc8   :  { %v74_v5 = vmul.f32 0.03125, %v69_v4 }
  0xca   :  { %v76_v6 = vsub.f32 %v64_v0, %v74_v5 }
  0xcb   :  { %v72_v7 = vpop.xlane.xlu0 %71 }
  0xcc   :  { %v75_v8 = vmul.f32 0.03125, %v72_v7  ;;  %v78_v9 = vmul.f32 %v76_v6, %v76_v6 }
  0xce   :  { %v77_v10 = vsub.f32 %v65_v1, %v75_v8  ;;  %v80_v11 = vsel %vm66_vm0, %v78_v9, 0.0 }
  0xcf   :  { %81 = vadd.xlane.f32.xlu1 %v80_v11 }
  0xd0   :  { %v79_v12 = vmul.f32 %v77_v10, %v77_v10 }
  0xd2   :  { %v83_v13 = vsel %vm66_vm0, %v79_v12, 0.0 }
  0xd3   :  { %84 = vadd.xlane.f32.xlu1 %v83_v13 }
 0x15c   :  { %v82_v17 = vpop.xlane.xlu1 %81 }
 0x15d   :  { %v86_v18 = vmul.f32 0.03125, %v82_v17 }
 0x15f   :  { %v88_v19 = vadd.f32 1e-05, %v86_v18 }
 0x160   :  { %v85_v20 = vpop.xlane.xlu1 %84 }
 0x161   :  { %237 = vrsqrt.f32 %v88_v19  ;;  %v87_v21 = vmul.f32 0.03125, %v85_v20 }
 0x163   :  { %v89_v22 = vadd.f32 1e-05, %v87_v21 }
 0x165   :  { %239 = vrsqrt.f32 %v89_v22 }
 0x16b   :  { %v238_v23 = vpop.eup %237 }
 0x16c   :  { %v92_v24 = vmul.f32 %v238_v23, %v76_v6 }
 0x16e   :  { %v101_v28 = vmul.f32 %v208_v25, %v92_v24 }
 0x16f   :  { %v240_v26 = vpop.eup %239 }
 0x170   :  { %v93_v27 = vmul.f32 %v240_v26, %v77_v10  ;;  %v110_v31 = vadd.f32 %v209_v29, %v101_v28 }
 0x172   :  { %v102_v30 = vmul.f32 %v208_v25, %v93_v27 }
 0x174   :  { %v111_v32 = vadd.f32 %v209_v29, %v102_v30 }
 0x176   :  { %v112_v33 = vpack.c.bf16 %v111_v32, %v110_v31 }
 0x178   :  { %222 = vmatmul.mubr.msk.bf16.vlgmr.msra.gmra.mrb[0].mxu0 %vm66_vm0, %v112_v33 }
 0x24b   :  { %v173_v36 = vpop.f32.mrb[0].mxu0 }
 0x24c   :  { %v174_v37 = vadd.f32 %v210_v34, %v173_v36  ;;  %v223_v38 = vpop.f32.mrb[1].mxu0 }
 0x24d   :  { %v176_v40 = vpop.f32.mrb[2].mxu0 }
 0x24e   :  { %v184_v41 = vmul.f32 1.1111112, %v174_v37  ;;  %v177_v42 = vadd.f32 %v210_v34, %v176_v40  ;;  %v224_v43 = vpop.f32.mrb[3].mxu0 }
 0x250   :  { %v186_v44 = vsel %vm182_vm2, %v184_v41, 0.0  ;;  %v185_v45 = vmul.f32 1.1111112, %v177_v42 }
 0x251   :  { %188 = vst.msk [vmem:[#allocation8] sm:$0xff] %vm66_vm0, %v186_v44 }
 0x252   :  { %v187_v46 = vsel %vm183_vm3, %v185_v45, 0.0 }
 0x253   :  { %189 = vst.msk [vmem:[#allocation8 + $0x8] sm:$0xff] %vm66_vm0, %v187_v46 }
 0x254   :  { %318 = shalt.err (!%p315_p0)
}
 0x255   :  { %s319_s22 = scalar_lea.hbm %s459_s6, 256 }
 0x256   :  { %p320_p1 = scmp.ne.s32.totalorder %s459_s6, %s319_s22  ;;  %p323_p2 = scmp.lt.u32.totalorder %s319_s22, %s459_s6 }
 0x258   :  { %p325_p3 = pnand %p323_p2, %p320_p1 }
 0x25a   :  { %328 = shalt.err (!%p325_p3)
}
 0x25b   :  { %201 = dma.vmem_to_hbm [thread:$0]  %s196_s18, 256, %s459_s6, [#allocation4], %s339_s3, %s339_s3, %s340_s21  }
 0x25c   :  { %333 = dma.done.wait [#allocation4], 256  }
 0x25d   :  { %334 = vsyncadd [#allocation4], 4294967040 }
 0x25e   :  { %205 = vsyncpa [#allocation3], 1 }
 0x25f   :  { %206 = vsyncpa [#allocation6], 1 }
 0x260   :  { %207 = vsyncpa [#allocation4], 1 }

</bundles_post_ra>
